<compile_context>
chip_gen: v7x
topology: tpu7x:2x2x1
jax: 0.10.0
libtpu: 0.0.40
codegen_flags: <defaults>
</compile_context>

<pallas_src>
import jax
import jax.numpy as jnp
from jax.experimental import pallas as pl
from jax.experimental.pallas import tpu as pltpu

IN_DIM = 784
HID_DIM = 200          # logical hidden width (LayerNorm normalizes over this)
HID_PAD = 256          # padded hidden width: one MXU tile, lanes 200..255 are zero
OUT_DIM = 10
OUT_PAD = 128          # lane-dense padded output width, lanes 10..127 are zero
LN_EPS = 1e-5
DEFAULT_TB = 2048      # batch tile: bf16 x tile = 2048*784*2B ~= 3.2 MB (x2 buffers)
                       # -> comfortably under the 32 MiB scoped VMEM default everywhere


def _round_up(n, m):
    return ((n + m - 1) // m) * m


def _choose_batch_tile(B, tb):
    """Pick the batch tile; force >=2 grid steps for mid-size batches so the
    "parallel" grid axis actually splits work across v7x's two TensorCores."""
    tb = min(tb, _round_up(B, 8))
    if B > 8 and B <= 2 * tb:
        tb = max(8, _round_up(B, 16) // 2)
    return tb


def classifier_kernel(x_ref, w1_ref, b1_ref, g_ref, beta_ref, w2_ref, b2_ref, o_ref):
    # ---- Linear(784 -> 256padded) + ReLU : bf16 MXU matmul, f32 accumulate ----
    x = x_ref[...]                                              # (TB, 784) bf16
    h = jnp.dot(x, w1_ref[...],                                 # (784, 256) bf16
                preferred_element_type=jnp.float32)             # (TB, 256) f32
    h = h + b1_ref[...]                                         # (1, 256) f32 broadcast
    h = jnp.maximum(h, 0.0)                                     # padded lanes stay exactly 0

    # ---- LayerNorm over the real 200 features (fused single-pass stats, f32) ----
    # Padded lanes of h are exactly zero, so full-width sums equal 200-lane sums.
    sum_h = jnp.sum(h, axis=-1, keepdims=True)                  # (TB, 1)
    sum_h2 = jnp.sum(h * h, axis=-1, keepdims=True)             # (TB, 1)
    mean = sum_h * (1.0 / HID_DIM)
    var = sum_h2 * (1.0 / HID_DIM) - mean * mean                # biased var, like torch
    var = jnp.maximum(var, 0.0)                                 # guard f32 cancellation
    inv = jax.lax.rsqrt(var + LN_EPS)                           # EUP
    # gamma/beta are zero on padded lanes -> hn padded lanes are exactly 0.
    hn = (h - mean) * inv * g_ref[...] + beta_ref[...]          # (TB, 256) f32

    # ---- Linear(256padded -> 128padded) + ReLU, bf16 lane-dense store ----
    out = jnp.dot(hn.astype(jnp.bfloat16), w2_ref[...],         # (256, 128) bf16
                  preferred_element_type=jnp.float32)           # (TB, 128) f32
    out = out + b2_ref[...]                                     # (1, 128) f32 broadcast
    o_ref[...] = jnp.maximum(out, 0.0).astype(o_ref.dtype)      # bf16 writeback


def classifier_forward(x, packed_params, tb=DEFAULT_TB):
    """x: (B, 784) bf16 activations (producer should emit bf16; any other dtype
    is cast here). packed_params: padded params from pack_params().
    Returns (B, 10) bf16 logits (post-ReLU)."""
    w1, b1, gamma, beta, w2, b2 = packed_params
    assert x.ndim == 2 and x.shape[1] == IN_DIM
    if x.dtype != jnp.bfloat16:
        # No-op when the producer already emits bf16 (the intended fast path).
        x = x.astype(jnp.bfloat16)
    B = x.shape[0]

    tb = _choose_batch_tile(B, tb)
    B_pad = _round_up(B, tb)
    if B_pad != B:
        x = jnp.pad(x, ((0, B_pad - B), (0, 0)))
    grid = (B_pad // tb,)

    flops = 2 * B_pad * (IN_DIM * HID_PAD + HID_PAD * OUT_PAD)
    bytes_accessed = (
        B_pad * IN_DIM * 2 + B_pad * OUT_PAD * 2             # bf16 activations in / out
        + w1.size * 2 + w2.size * 2                          # bf16 weights
        + (b1.size + gamma.size + beta.size + b2.size) * 4   # f32 vectors
    )

    out = pl.pallas_call(
        classifier_kernel,
        out_shape=jax.ShapeDtypeStruct((B_pad, OUT_PAD), jnp.bfloat16),
        grid_spec=pltpu.PrefetchScalarGridSpec(
            num_scalar_prefetch=0,
            grid=grid,
            in_specs=[
                pl.BlockSpec((tb, IN_DIM), lambda i: (i, 0)),        # x: streamed per tile (bf16)
                pl.BlockSpec((IN_DIM, HID_PAD), lambda i: (0, 0)),   # w1: VMEM-resident
                pl.BlockSpec((1, HID_PAD), lambda i: (0, 0)),        # b1
                pl.BlockSpec((1, HID_PAD), lambda i: (0, 0)),        # gamma
                pl.BlockSpec((1, HID_PAD), lambda i: (0, 0)),        # beta
                pl.BlockSpec((HID_PAD, OUT_PAD), lambda i: (0, 0)),  # w2
                pl.BlockSpec((1, OUT_PAD), lambda i: (0, 0)),        # b2
            ],
            out_specs=pl.BlockSpec((tb, OUT_PAD), lambda i: (i, 0)),
        ),
        compiler_params=pltpu.CompilerParams(
            dimension_semantics=("parallel",),   # megacore split on v7x; no-op on v5e/v6e
        ),
        cost_estimate=pl.CostEstimate(
            flops=int(flops),
            transcendentals=int(B_pad),          # one rsqrt per row
            bytes_accessed=int(bytes_accessed),
        ),
    )(x, w1, b1, gamma, beta, w2, b2)

    # XLA fuses this slice with the consumer; with bf16 output the residual
    # padding traffic is negligible.
    return out[:B, :OUT_DIM]


def init_params(key):
    """Deterministic synthetic parameters with the module's logical shapes."""
    k1, k2, k3, k4 = jax.random.split(key, 4)
    w1 = jax.random.normal(k1, (IN_DIM, HID_DIM), jnp.float32) * (1.0 / IN_DIM ** 0.5)
    b1 = jax.random.normal(k2, (HID_DIM,), jnp.float32) * 0.01
    gamma = jnp.ones((HID_DIM,), jnp.float32)
    beta = jnp.zeros((HID_DIM,), jnp.float32)
    w2 = jax.random.normal(k3, (HID_DIM, OUT_DIM), jnp.float32) * (1.0 / HID_DIM ** 0.5)
    b2 = jax.random.normal(k4, (OUT_DIM,), jnp.float32) * 0.01
    return (w1, b1, gamma, beta, w2, b2)


def pack_params(params):
    """Pad hidden 200->256 and output 10->128 with EXACT ZEROS (the kernel's
    LayerNorm/matmul correctness relies on zeroed pad lanes), cast weights to bf16."""
    w1, b1, gamma, beta, w2, b2 = params
    w1p = jnp.zeros((IN_DIM, HID_PAD), jnp.float32).at[:, :HID_DIM].set(w1).astype(jnp.bfloat16)
    b1p = jnp.zeros((1, HID_PAD), jnp.float32).at[0, :HID_DIM].set(b1)
    gp = jnp.zeros((1, HID_PAD), jnp.float32).at[0, :HID_DIM].set(gamma)
    bp = jnp.zeros((1, HID_PAD), jnp.float32).at[0, :HID_DIM].set(beta)
    w2p = jnp.zeros((HID_PAD, OUT_PAD), jnp.float32).at[:HID_DIM, :OUT_DIM].set(w2).astype(jnp.bfloat16)
    b2p = jnp.zeros((1, OUT_PAD), jnp.float32).at[0, :OUT_DIM].set(b2)
    return (w1p, b1p, gp, bp, w2p, b2p)


def reference_forward(x_bf16, params):
    """Pure-JAX reference with the same bf16 matmul operands as the kernel
    (LayerNorm / bias / ReLU in f32, f32 accumulation)."""
    w1, b1, gamma, beta, w2, b2 = params
    h = jnp.dot(x_bf16, w1.astype(jnp.bfloat16),
                preferred_element_type=jnp.float32) + b1
    h = jnp.maximum(h, 0.0)
    mean = jnp.mean(h, axis=-1, keepdims=True)
    var = jnp.mean(jnp.square(h - mean), axis=-1, keepdims=True)
    hn = (h - mean) * jax.lax.rsqrt(var + LN_EPS) * gamma + beta
    out = jnp.dot(hn.astype(jnp.bfloat16), w2.astype(jnp.bfloat16),
                  preferred_element_type=jnp.float32) + b2
    return jnp.maximum(out, 0.0)


if __name__ == "__main__":
    key = jax.random.PRNGKey(0)
    kx, kp = jax.random.split(key)

    B = 8  # small test batch; the kernel tiles larger batches automatically
    # Producer emits bf16 activations (the kernel's streaming dtype).
    x = jax.random.normal(kx, (B, IN_DIM), jnp.float32).astype(jnp.bfloat16)
    params = init_params(kp)
    packed = pack_params(params)

    out = classifier_forward(x, packed)
    out = jax.block_until_ready(out)

    ref = reference_forward(x, params)
    assert out.shape == (B, OUT_DIM)
    assert out.dtype == jnp.bfloat16
    assert jnp.allclose(out.astype(jnp.float32), ref, atol=3e-2, rtol=3e-2), \
        "mismatch vs JAX reference"

    print("KERNEL_OK")
</pallas_src>

<mosaic_0001>
module attributes {stable_mosaic.version = 11 : i64} {
  func.func @classifier_kernel(%arg0: i32, %arg1: memref<8x784xbf16, #tpu.memory_space<vmem>>, %arg2: memref<784x256xbf16, #tpu.memory_space<vmem>>, %arg3: memref<1x256xf32, #tpu.memory_space<vmem>>, %arg4: memref<1x256xf32, #tpu.memory_space<vmem>>, %arg5: memref<1x256xf32, #tpu.memory_space<vmem>>, %arg6: memref<256x128xbf16, #tpu.memory_space<vmem>>, %arg7: memref<1x128xf32, #tpu.memory_space<vmem>>, %arg8: memref<8x128xbf16, #tpu.memory_space<vmem>>) attributes {dimension_semantics = [#tpu.dimension_semantics<parallel>], iteration_bounds = array<i64: 1>, scalar_prefetch = 0 : i64, scratch_operands = 0 : i64, tpu.core_type = #tpu.core_type<tc>, window_params = [{transform_indices = @transform_0, window_bounds = array<i64: 8, 784>}, {pipeline_mode = #tpu.pipeline_mode<synchronous>, transform_indices = @transform_1, window_bounds = array<i64: 784, 256>}, {pipeline_mode = #tpu.pipeline_mode<synchronous>, transform_indices = @transform_2, window_bounds = array<i64: 1, 256>}, {pipeline_mode = #tpu.pipeline_mode<synchronous>, transform_indices = @transform_3, window_bounds = array<i64: 1, 256>}, {pipeline_mode = #tpu.pipeline_mode<synchronous>, transform_indices = @transform_4, window_bounds = array<i64: 1, 256>}, {pipeline_mode = #tpu.pipeline_mode<synchronous>, transform_indices = @transform_5, window_bounds = array<i64: 256, 128>}, {pipeline_mode = #tpu.pipeline_mode<synchronous>, transform_indices = @transform_6, window_bounds = array<i64: 1, 128>}, {transform_indices = @transform_7, window_bounds = array<i64: 8, 128>}]} {
    %c0 = arith.constant 0 : index
    %c0_0 = arith.constant 0 : index
    %0 = vector.load %arg1[%c0, %c0_0] : memref<8x784xbf16, #tpu.memory_space<vmem>>, vector<8x784xbf16>
    %c0_1 = arith.constant 0 : index
    %c0_2 = arith.constant 0 : index
    %1 = vector.load %arg2[%c0_1, %c0_2] : memref<784x256xbf16, #tpu.memory_space<vmem>>, vector<784x256xbf16>
    %cst = arith.constant dense<0.000000e+00> : vector<8x256xf32>
    %2 = tpu.matmul %0, %1, %cst {dimension_numbers = #tpu.dot_dimension_numbers<[1], [0], [0], [1], [0, 0, 1, 1], [], []>} : vector<8x784xbf16>, vector<784x256xbf16>, vector<8x256xf32> -> vector<8x256xf32>
    %c0_3 = arith.constant 0 : index
    %c0_4 = arith.constant 0 : index
    %3 = vector.load %arg3[%c0_3, %c0_4] : memref<1x256xf32, #tpu.memory_space<vmem>>, vector<1x256xf32>
    %4 = vector.broadcast %3 : vector<1x256xf32> to vector<8x256xf32>
    %5 = arith.addf %2, %4 : vector<8x256xf32>
    %cst_5 = arith.constant 0.000000e+00 : f32
    %6 = vector.broadcast %cst_5 : f32 to vector<8x256xf32>
    %7 = arith.maximumf %5, %6 : vector<8x256xf32>
    %cst_6 = arith.constant dense<0.000000e+00> : vector<8xf32>
    %8 = vector.multi_reduction <add>, %7, %cst_6 [1] : vector<8x256xf32> to vector<8xf32>
    %9 = vector.shape_cast %8 : vector<8xf32> to vector<8x1xf32>
    %10 = arith.mulf %7, %7 : vector<8x256xf32>
    %cst_7 = arith.constant dense<0.000000e+00> : vector<8xf32>
    %11 = vector.multi_reduction <add>, %10, %cst_7 [1] : vector<8x256xf32> to vector<8xf32>
    %12 = vector.shape_cast %11 : vector<8xf32> to vector<8x1xf32>
    %cst_8 = arith.constant 5.000000e-03 : f32
    %13 = vector.broadcast %cst_8 : f32 to vector<8x1xf32>
    %14 = arith.mulf %9, %13 : vector<8x1xf32>
    %cst_9 = arith.constant 5.000000e-03 : f32
    %15 = vector.broadcast %cst_9 : f32 to vector<8x1xf32>
    %16 = arith.mulf %12, %15 : vector<8x1xf32>
    %17 = arith.mulf %14, %14 : vector<8x1xf32>
    %18 = arith.subf %16, %17 : vector<8x1xf32>
    %cst_10 = arith.constant 0.000000e+00 : f32
    %19 = vector.broadcast %cst_10 : f32 to vector<8x1xf32>
    %20 = arith.maximumf %18, %19 : vector<8x1xf32>
    %cst_11 = arith.constant 9.99999974E-6 : f32
    %21 = vector.broadcast %cst_11 : f32 to vector<8x1xf32>
    %22 = arith.addf %20, %21 : vector<8x1xf32>
    %23 = math.rsqrt %22 : vector<8x1xf32>
    %24 = vector.broadcast %14 : vector<8x1xf32> to vector<8x256xf32>
    %25 = arith.subf %7, %24 : vector<8x256xf32>
    %26 = vector.broadcast %23 : vector<8x1xf32> to vector<8x256xf32>
    %27 = arith.mulf %25, %26 : vector<8x256xf32>
    %c0_12 = arith.constant 0 : index
    %c0_13 = arith.constant 0 : index
    %28 = vector.load %arg4[%c0_12, %c0_13] : memref<1x256xf32, #tpu.memory_space<vmem>>, vector<1x256xf32>
    %29 = vector.broadcast %28 : vector<1x256xf32> to vector<8x256xf32>
    %30 = arith.mulf %27, %29 : vector<8x256xf32>
    %c0_14 = arith.constant 0 : index
    %c0_15 = arith.constant 0 : index
    %31 = vector.load %arg5[%c0_14, %c0_15] : memref<1x256xf32, #tpu.memory_space<vmem>>, vector<1x256xf32>
    %32 = vector.broadcast %31 : vector<1x256xf32> to vector<8x256xf32>
    %33 = arith.addf %30, %32 : vector<8x256xf32>
    %34 = arith.truncf %33 : vector<8x256xf32> to vector<8x256xbf16>
    %c0_16 = arith.constant 0 : index
    %c0_17 = arith.constant 0 : index
    %35 = vector.load %arg6[%c0_16, %c0_17] : memref<256x128xbf16, #tpu.memory_space<vmem>>, vector<256x128xbf16>
    %cst_18 = arith.constant dense<0.000000e+00> : vector<8x128xf32>
    %36 = tpu.matmul %34, %35, %cst_18 {dimension_numbers = #tpu.dot_dimension_numbers<[1], [0], [0], [1], [0, 0, 1, 1], [], []>} : vector<8x256xbf16>, vector<256x128xbf16>, vector<8x128xf32> -> vector<8x128xf32>
    %c0_19 = arith.constant 0 : index
    %c0_20 = arith.constant 0 : index
    %37 = vector.load %arg7[%c0_19, %c0_20] : memref<1x128xf32, #tpu.memory_space<vmem>>, vector<1x128xf32>
    %38 = vector.broadcast %37 : vector<1x128xf32> to vector<8x128xf32>
    %39 = arith.addf %36, %38 : vector<8x128xf32>
    %cst_21 = arith.constant 0.000000e+00 : f32
    %40 = vector.broadcast %cst_21 : f32 to vector<8x128xf32>
    %41 = arith.maximumf %39, %40 : vector<8x128xf32>
    %42 = arith.truncf %41 : vector<8x128xf32> to vector<8x128xbf16>
    %c0_22 = arith.constant 0 : index
    %c0_23 = arith.constant 0 : index
    %43 = vector.load %arg8[%c0_22, %c0_23] : memref<8x128xbf16, #tpu.memory_space<vmem>>, vector<8x128xbf16>
    tpu.vector_store %arg8[%c0_22, %c0_23], %42 {strides = array<i32>} : memref<8x128xbf16, #tpu.memory_space<vmem>>, vector<8x128xbf16>,
    return
  }
  func.func @transform_0(%arg0: i32) -> (i32, i32) {
    %c0_i32 = arith.constant 0 : i32
    %c0_i32_0 = arith.constant 0 : i32
    return %arg0, %c0_i32 : i32, i32
  }
  func.func @transform_1(%arg0: i32) -> (i32, i32) {
    %c0_i32 = arith.constant 0 : i32
    %c0_i32_0 = arith.constant 0 : i32
    %c0_i32_1 = arith.constant 0 : i32
    return %c0_i32, %c0_i32_0 : i32, i32
  }
  func.func @transform_2(%arg0: i32) -> (i32, i32) {
    %c0_i32 = arith.constant 0 : i32
    %c0_i32_0 = arith.constant 0 : i32
    %c0_i32_1 = arith.constant 0 : i32
    return %c0_i32, %c0_i32_0 : i32, i32
  }
  func.func @transform_3(%arg0: i32) -> (i32, i32) {
    %c0_i32 = arith.constant 0 : i32
    %c0_i32_0 = arith.constant 0 : i32
    %c0_i32_1 = arith.constant 0 : i32
    return %c0_i32, %c0_i32_0 : i32, i32
  }
  func.func @transform_4(%arg0: i32) -> (i32, i32) {
    %c0_i32 = arith.constant 0 : i32
    %c0_i32_0 = arith.constant 0 : i32
    %c0_i32_1 = arith.constant 0 : i32
    return %c0_i32, %c0_i32_0 : i32, i32
  }
  func.func @transform_5(%arg0: i32) -> (i32, i32) {
    %c0_i32 = arith.constant 0 : i32
    %c0_i32_0 = arith.constant 0 : i32
    %c0_i32_1 = arith.constant 0 : i32
    return %c0_i32, %c0_i32_0 : i32, i32
  }
  func.func @transform_6(%arg0: i32) -> (i32, i32) {
    %c0_i32 = arith.constant 0 : i32
    %c0_i32_0 = arith.constant 0 : i32
    %c0_i32_1 = arith.constant 0 : i32
    return %c0_i32, %c0_i32_0 : i32, i32
  }
  func.func @transform_7(%arg0: i32) -> (i32, i32) {
    %c0_i32 = arith.constant 0 : i32
    %c0_i32_0 = arith.constant 0 : i32
    return %arg0, %c0_i32 : i32, i32
  }
}

</mosaic_0001>

<bundles_post_ra>
// kernel: tpu_custom_call.1
= control target key start
LH: loop header
LB: loop body
LE: loop exit
PB: predicated region body
PF: predicated region fallthrough
CT: control target
= control target key end

     0   :  { %12 = vsyncpa [#allocation3], 0  ;;  %s1669_s0 = inlined_call_operand.hbm [shape: bf16[8,784], index: 0, kind: input, shape index: {}]   ;;  %s1670_s1 = inlined_call_operand.hbm [shape: bf16[784,256], index: 1, kind: input, shape index: {}]   ;;  %s1671_s2 = inlined_call_operand.vmem [shape: f32[1,256], index: 2, kind: input, shape index: {}]   ;;  %s1672_s3 = inlined_call_operand.vmem [shape: f32[1,256], index: 3, kind: input, shape index: {}]   ;;  %s1673_s4 = inlined_call_operand.vmem [shape: f32[1,256], index: 4, kind: input, shape index: {}]   ;;  %s1674_s5 = inlined_call_operand.hbm [shape: bf16[256,128], index: 5, kind: input, shape index: {}]   ;;  %s1675_s6 = inlined_call_operand.vmem [shape: f32[1,128], index: 6, kind: input, shape index: {}]   ;;  %s1676_s7 = inlined_call_operand.hbm [shape: bf16[8,128], index: 7, kind: output, shape index: {}]  }
   0x1   :  { %13 = vsyncpa [#allocation6], 0 }
   0x2   :  { %14 = vsyncpa [#allocation4], 0  ;;  %s1538_s24 = smov [#allocation5]   ;;  %s1444_s28 = scalar_lea.hbm %s1670_s1, 12544 }
   0x3   :  { %s30_s25 = sshll.u32 %s1538_s24, 4  ;;  %p1445_p0 = scmp.ne.s32.totalorder %s1670_s1, %s1444_s28  ;;  %s31_s25 = int_to_ptr.vmem [resolvable:$true] %s30_s25 }
   0x4   :  { %p1448_p1 = scmp.lt.u32.totalorder %s1444_s28, %s1670_s1 }
   0x6   :  { %p1450_p2 = pnand %p1448_p1, %p1445_p0 }
   0x8   :  { %1453 = shalt.err (!%p1450_p2)
}
   0x9   :  { %s1454_s10 = scalar_lea.vmem %s31_s25, 12544  ;;  %p1459_p4 = scmp.lt.s32.totalorder %s31_s25, %s31_s25 }
   0xa   :  { %p1455_p3 = scmp.ne.s32.totalorder %s31_s25, %s1454_s10  ;;  %p1460_p5 = scmp.lt.s32.totalorder %s1454_s10, %s1454_s10 }
   0xc   :  { %p1461_p6 = por %p1460_p5, %p1459_p4 }
   0xe   :  { %p1462_p7 = pnand %p1461_p6, %p1455_p3 }
  0x10   :  { %1465 = shalt.err (!%p1462_p7)
}
  0x11   :  { %s1539_s11 = smov 128   ;;  %s1540_s12 = smov 8  }
  0x12   :  { %36 = dma.hbm_to_vmem [thread:$0]  %s1670_s1, 12544, %s31_s25, [#allocation6], %s1539_s11, %s1539_s11, %s1540_s12  }
  0x13   :  { %s1541_s15 = smov [#allocation2]   ;;  %s1542_s17 = smov [#allocation7]  }
  0x14   :  { %s21_s16 = sshll.u32 %s1541_s15, 4  ;;  %s48_s18 = sshll.u32 %s1542_s17, 4  ;;  %s22_s16 = int_to_ptr.vmem [resolvable:$true] %s21_s16  ;;  %s49_s18 = int_to_ptr.vmem [resolvable:$true] %s48_s18 }
  0x15   :  { %s1466_s21 = scalar_lea.hbm %s1669_s0, 448 }
  0x16   :  { %p1467_p8 = scmp.ne.s32.totalorder %s1669_s0, %s1466_s21  ;;  %p1470_p9 = scmp.lt.u32.totalorder %s1466_s21, %s1669_s0 }
  0x18   :  { %p1472_p10 = pnand %p1470_p9, %p1467_p8 }
  0x1a   :  { %1475 = shalt.err (!%p1472_p10)
}
  0x1b   :  { %s1476_s1 = scalar_lea.vmem %s22_s16, 448  ;;  %p1481_p12 = scmp.lt.s32.totalorder %s22_s16, %s22_s16 }
  0x1c   :  { %p1477_p11 = scmp.ne.s32.totalorder %s22_s16, %s1476_s1  ;;  %p1482_p13 = scmp.lt.s32.totalorder %s1476_s1, %s1476_s1 }
  0x1e   :  { %p1483_p0 = por %p1482_p13, %p1481_p12 }
  0x20   :  { %p1484_p1 = pnand %p1483_p0, %p1477_p11 }
  0x22   :  { %1487 = shalt.err (!%p1484_p1)
}
  0x23   :  { %24 = dma.hbm_to_vmem [thread:$0]  %s1669_s0, 448, %s22_s16, [#allocation3]  }
  0x24   :  { %s1488_s30 = scalar_lea.hbm %s1674_s5, 2048 }
  0x25   :  { %p1489_p2 = scmp.ne.s32.totalorder %s1674_s5, %s1488_s30  ;;  %p1492_p3 = scmp.lt.u32.totalorder %s1488_s30, %s1674_s5 }
  0x27   :  { %p1494_p4 = pnand %p1492_p3, %p1489_p2 }
  0x29   :  { %1497 = shalt.err (!%p1494_p4)
}
  0x2a   :  { %s1498_s12 = scalar_lea.vmem %s49_s18, 2048  ;;  %p1503_p6 = scmp.lt.s32.totalorder %s49_s18, %s49_s18 }
  0x2b   :  { %p1499_p5 = scmp.ne.s32.totalorder %s49_s18, %s1498_s12  ;;  %p1504_p7 = scmp.lt.s32.totalorder %s1498_s12, %s1498_s12 }
  0x2d   :  { %p1505_p8 = por %p1504_p7, %p1503_p6 }
  0x2f   :  { %p1506_p9 = pnand %p1505_p8, %p1499_p5 }
  0x31   :  { %1509 = shalt.err (!%p1506_p9)
}
  0x32   :  { %s1543_s0 = smov 64   ;;  %s1544_s13 = smov 4  }
  0x33   :  { %54 = dma.hbm_to_vmem [thread:$0]  %s1674_s5, 2048, %s49_s18, [#allocation6], %s1543_s0, %s1543_s0, %s1544_s13  }
  0x34   :  { %1532 = dma.done.wait [#allocation3], 448  }
  0x35   :  { %1533 = vsyncadd [#allocation3], 4294966848 }
  0x36   :  { %1534 = dma.done.wait [#allocation6], 14592  }
  0x37   :  { %1535 = vsyncadd [#allocation6], 4294952704  ;;  %v1272_v0 = vld [vmem:[#allocation5 + $0x104] ss:$8 sps:$4 sm:$0xff]   ;;  %v1274_v1 = vld [vmem:[#allocation5 + $0x100] ss:$8 sps:$4 sm:$0xff]  }
  0x38   :  { %740 = vmatprep.subr.bf16.mxu0 %v1272_v0  ;;  %v1275_v2 = vld [vmem:[#allocation5 + $0x114] ss:$8 sps:$4 sm:$0xff]   ;;  %v1277_v3 = vld [vmem:[#allocation5 + $0x110] ss:$8 sps:$4 sm:$0xff]   ;;  %v1278_v4 = vld [vmem:[#allocation5 + $0x124] ss:$8 sps:$4 sm:$0xff]  }
  0x39   :  { %741 = vmatpush1.bf16.msra.mxu0 %v1274_v1  ;;  %v1280_v5 = vld [vmem:[#allocation5 + $0x120] ss:$8 sps:$4 sm:$0xff]   ;;  %v1281_v6 = vld [vmem:[#allocation5 + $0x134] ss:$8 sps:$4 sm:$0xff]   ;;  %v1283_v7 = vld [vmem:[#allocation5 + $0x130] ss:$8 sps:$4 sm:$0xff]  }
  0x3a   :  { %742 = vmatprep.subr.bf16.mxu0 %v1275_v2  ;;  %v1284_v8 = vld [vmem:[#allocation5 + $0x144] ss:$8 sps:$4 sm:$0xff]   ;;  %v1286_v9 = vld [vmem:[#allocation5 + $0x140] ss:$8 sps:$4 sm:$0xff]   ;;  %v1287_v10 = vld [vmem:[#allocation5 + $0x154] ss:$8 sps:$4 sm:$0xff]  }
  0x3b   :  { %v1289_v11 = vld [vmem:[#allocation5 + $0x150] ss:$8 sps:$4 sm:$0xff]   ;;  %v1314_v12 = vld [vmem:[#allocation5 + $0x4] ss:$8 sps:$4 sm:$0xff]   ;;  %v1316_v13 = vld [vmem:[#allocation5] ss:$8 sps:$4 sm:$0xff]  }
  0x3c   :  { %v1290_v14 = vld [vmem:[#allocation5 + $0x164] ss:$8 sps:$4 sm:$0xff]   ;;  %699 = vmatprep.subr.bf16.mxu1 %v1314_v12  ;;  %v1320_v15 = vld [vmem:[#allocation5 + $0x14] ss:$8 sps:$4 sm:$0xff]   ;;  %v1322_v16 = vld [vmem:[#allocation5 + $0x10] ss:$8 sps:$4 sm:$0xff]  }
  0x3d   :  { %743 = vmatpush1.bf16.msra.mxu0 %v1277_v3  ;;  %700 = vmatpush1.bf16.msra.mxu1 %v1316_v13  ;;  %v1292_v17 = vld [vmem:[#allocation5 + $0x160] ss:$8 sps:$4 sm:$0xff]   ;;  %v1293_v18 = vld [vmem:[#allocation5 + $0x174] ss:$8 sps:$4 sm:$0xff]   ;;  %v1326_v19 = vld [vmem:[#allocation5 + $0x24] ss:$8 sps:$4 sm:$0xff]  }
  0x3e   :  { %744 = vmatprep.subr.bf16.mxu0 %v1278_v4  ;;  %701 = vmatprep.subr.bf16.mxu1 %v1320_v15  ;;  %v1623_v20 = vld [vmem:[#allocation2 + $0x8] sm:$0xff]  ;;  %v1328_v22 = vld [vmem:[#allocation5 + $0x20] ss:$8 sps:$4 sm:$0xff]   ;;  %v1334_v24 = vld [vmem:[#allocation5 + $0x34] ss:$8 sps:$4 sm:$0xff]   ;;  %vm695_vm0 = vcmask 130048  }
  0x3f   :  { %v1295_v21 = vld [vmem:[#allocation5 + $0x170] ss:$8 sps:$4 sm:$0xff]   ;;  %v1111_v23 = vcombine.high %v1623_v20, %v1623_v20  ;;  %v1296_v25 = vld [vmem:[#allocation5 + $0x184] ss:$8 sps:$4 sm:$0xff]   ;;  %v1298_v26 = vld [vmem:[#allocation5 + $0x180] ss:$8 sps:$4 sm:$0xff]   ;;  %v1110_v60 = vcombine.low %v1623_v20, %v1623_v20 }
  0x40   :  { %v1336_v27 = vld [vmem:[#allocation5 + $0x30] ss:$8 sps:$4 sm:$0xff]   ;;  %v1340_v28 = vld [vmem:[#allocation5 + $0x44] ss:$8 sps:$4 sm:$0xff]   ;;  %v1299_v29 = vld [vmem:[#allocation5 + $0x194] ss:$8 sps:$4 sm:$0xff]  }
  0x41   :  { %745 = vmatpush1.bf16.msra.mxu0 %v1280_v5  ;;  %702 = vmatpush1.bf16.msra.mxu1 %v1322_v16  ;;  %v1301_v30 = vld [vmem:[#allocation5 + $0x190] ss:$8 sps:$4 sm:$0xff]   ;;  %v1342_v31 = vld [vmem:[#allocation5 + $0x40] ss:$8 sps:$4 sm:$0xff]   ;;  %v1346_v32 = vld [vmem:[#allocation5 + $0x54] ss:$8 sps:$4 sm:$0xff]  }
  0x42   :  { %746 = vmatprep.subr.bf16.mxu0 %v1281_v6  ;;  %703 = vmatprep.subr.bf16.mxu1 %v1326_v19  ;;  %v1302_v33 = vld [vmem:[#allocation5 + $0x1a4] ss:$8 sps:$4 sm:$0xff]   ;;  %v1304_v34 = vld [vmem:[#allocation5 + $0x1a0] ss:$8 sps:$4 sm:$0xff]   ;;  %v1348_v35 = vld [vmem:[#allocation5 + $0x50] ss:$8 sps:$4 sm:$0xff]  }
  0x43   :  { %772 = vmatprep.mubr.bf16.mxu0 %v1111_v23  ;;  %v1352_v36 = vld [vmem:[#allocation5 + $0x64] ss:$8 sps:$4 sm:$0xff]   ;;  %v1305_v37 = vld [vmem:[#allocation5 + $0x1b4] ss:$8 sps:$4 sm:$0xff]   ;;  %v1307_v38 = vld [vmem:[#allocation5 + $0x1b0] ss:$8 sps:$4 sm:$0xff]  }
  0x44   :  { %v1354_v39 = vld [vmem:[#allocation5 + $0x60] ss:$8 sps:$4 sm:$0xff]   ;;  %v1358_v40 = vld [vmem:[#allocation5 + $0x74] ss:$8 sps:$4 sm:$0xff]   ;;  %v1308_v41 = vld [vmem:[#allocation5 + $0x1c4] ss:$8 sps:$4 sm:$0xff]  }
  0x45   :  { %747 = vmatpush1.bf16.msra.mxu0 %v1283_v7  ;;  %704 = vmatpush1.bf16.msra.mxu1 %v1328_v22  ;;  %v1310_v42 = vld [vmem:[#allocation5 + $0x1c0] ss:$8 sps:$4 sm:$0xff]   ;;  %v1360_v43 = vld [vmem:[#allocation5 + $0x70] ss:$8 sps:$4 sm:$0xff]   ;;  %v1364_v44 = vld [vmem:[#allocation5 + $0x84] ss:$8 sps:$4 sm:$0xff]  }
  0x46   :  { %748 = vmatprep.subr.bf16.mxu0 %v1284_v8  ;;  %705 = vmatprep.subr.bf16.mxu1 %v1334_v24  ;;  %v1311_v45 = vld [vmem:[#allocation5 + $0x1d4] ss:$8 sps:$4 sm:$0xff]   ;;  %v1313_v46 = vld [vmem:[#allocation5 + $0x1d0] ss:$8 sps:$4 sm:$0xff]   ;;  %v1366_v47 = vld [vmem:[#allocation5 + $0x80] ss:$8 sps:$4 sm:$0xff]  }
  0x47   :  { %v1370_v48 = vld [vmem:[#allocation5 + $0x94] ss:$8 sps:$4 sm:$0xff]   ;;  %v1317_v49 = vld [vmem:[#allocation5 + $0x1e4] ss:$8 sps:$4 sm:$0xff]   ;;  %v1319_v50 = vld [vmem:[#allocation5 + $0x1e0] ss:$8 sps:$4 sm:$0xff]  }
  0x48   :  { %v1372_v51 = vld [vmem:[#allocation5 + $0x90] ss:$8 sps:$4 sm:$0xff]   ;;  %v1376_v52 = vld [vmem:[#allocation5 + $0xa4] ss:$8 sps:$4 sm:$0xff]   ;;  %v1323_v53 = vld [vmem:[#allocation5 + $0x1f4] ss:$8 sps:$4 sm:$0xff]  }
  0x49   :  { %749 = vmatpush1.bf16.msra.mxu0 %v1286_v9  ;;  %706 = vmatpush1.bf16.msra.mxu1 %v1336_v27  ;;  %v1325_v54 = vld [vmem:[#allocation5 + $0x1f0] ss:$8 sps:$4 sm:$0xff]   ;;  %v1378_v55 = vld [vmem:[#allocation5 + $0xa0] ss:$8 sps:$4 sm:$0xff]   ;;  %v1382_v56 = vld [vmem:[#allocation5 + $0xb4] ss:$8 sps:$4 sm:$0xff]  }
  0x4a   :  { %750 = vmatprep.subr.bf16.mxu0 %v1287_v10  ;;  %707 = vmatprep.subr.bf16.mxu1 %v1340_v28  ;;  %v1333_v57 = vld [vmem:[#allocation5 + $0x204] ss:$8 sps:$4 sm:$0xff]   ;;  %v1331_v58 = vld [vmem:[#allocation5 + $0x200] ss:$8 sps:$4 sm:$0xff]   ;;  %v1384_v61 = vld [vmem:[#allocation5 + $0xb0] ss:$8 sps:$4 sm:$0xff]  }
  0x4b   :  { %v67_v59 = vld [vmem:[#allocation2] sm:$0xff]  ;;  %v1339_v0 = vld [vmem:[#allocation5 + $0x214] ss:$8 sps:$4 sm:$0xff]   ;;  %v1337_v1 = vld [vmem:[#allocation5 + $0x210] ss:$8 sps:$4 sm:$0xff]   ;;  %v1545_v23 = vmov 0  }
  0x4c   :  { %v1109_v62 = vcombine.high %v67_v59, %v67_v59  ;;  %v1388_v63 = vld [vmem:[#allocation5 + $0xc4] ss:$8 sps:$4 sm:$0xff]   ;;  %v1390_v3 = vld [vmem:[#allocation5 + $0xc0] ss:$8 sps:$4 sm:$0xff]   ;;  %v1629_v4 = vld [vmem:[#allocation2 + $0x10] sm:$0xff]  ;;  %v1108_v19 = vcombine.low %v67_v59, %v67_v59  ;;  %s1546_s20 = smov [#allocation8]  }
  0x4d   :  { %751 = vmatpush1.bf16.msra.mxu0 %v1289_v11  ;;  %708 = vmatpush1.bf16.msra.mxu1 %v1342_v31  ;;  %v1345_v2 = vld [vmem:[#allocation5 + $0x224] ss:$8 sps:$4 sm:$0xff]   ;;  %v1394_v5 = vld [vmem:[#allocation5 + $0xd4] ss:$8 sps:$4 sm:$0xff]   ;;  %v1113_v6 = vcombine.high %v1629_v4, %v1629_v4  ;;  %v1396_v7 = vld [vmem:[#allocation5 + $0xd0] ss:$8 sps:$4 sm:$0xff]  }
  0x4e   :  { %752 = vmatprep.subr.bf16.mxu0 %v1290_v14  ;;  %709 = vmatprep.subr.bf16.mxu1 %v1346_v32  ;;  %v1343_v8 = vld [vmem:[#allocation5 + $0x220] ss:$8 sps:$4 sm:$0xff]   ;;  %v1400_v9 = vld [vmem:[#allocation5 + $0xe4] ss:$8 sps:$4 sm:$0xff]   ;;  %v1351_v10 = vld [vmem:[#allocation5 + $0x234] ss:$8 sps:$4 sm:$0xff]  }
  0x4f   :  { %731 = vmatprep.mubr.bf16.mxu1 %v1109_v62  ;;  %v1402_v11 = vld [vmem:[#allocation5 + $0xe0] ss:$8 sps:$4 sm:$0xff]   ;;  %v1349_v12 = vld [vmem:[#allocation5 + $0x230] ss:$8 sps:$4 sm:$0xff]   ;;  %v1406_v13 = vld [vmem:[#allocation5 + $0xf4] ss:$8 sps:$4 sm:$0xff]  }
  0x50   :  { %v1357_v14 = vld [vmem:[#allocation5 + $0x244] ss:$8 sps:$4 sm:$0xff]   ;;  %v1408_v15 = vld [vmem:[#allocation5 + $0xf0] ss:$8 sps:$4 sm:$0xff]   ;;  %v1355_v16 = vld [vmem:[#allocation5 + $0x240] ss:$8 sps:$4 sm:$0xff]  }
  0x51   :  { %753 = vmatpush1.bf16.msra.mxu0 %v1292_v17  ;;  %710 = vmatpush1.bf16.msra.mxu1 %v1348_v35  ;;  %v1419_v17 = vld [vmem:[#allocation5 + $0x304] ss:$8 sps:$4 sm:$0xff]   ;;  %v1417_v20 = vld [vmem:[#allocation5 + $0x300] ss:$8 sps:$4 sm:$0xff]   ;;  %v1373_v27 = vld [vmem:[#allocation5 + $0x270] ss:$8 sps:$4 sm:$0xff]  }
  0x52   :  { %754 = vmatprep.subr.bf16.mxu0 %v1293_v18  ;;  %711 = vmatprep.subr.bf16.mxu1 %v1352_v36  ;;  %v1363_v18 = vld [vmem:[#allocation5 + $0x254] ss:$8 sps:$4 sm:$0xff]   ;;  %v1369_v22 = vld [vmem:[#allocation5 + $0x264] ss:$8 sps:$4 sm:$0xff]   ;;  %v1367_v24 = vld [vmem:[#allocation5 + $0x260] ss:$8 sps:$4 sm:$0xff]  }
  0x53   :  { %v1381_v28 = vld [vmem:[#allocation5 + $0x284] ss:$8 sps:$4 sm:$0xff]   ;;  %v1385_v31 = vld [vmem:[#allocation5 + $0x290] ss:$8 sps:$4 sm:$0xff]   ;;  %s1098_s21 = sshll.u32 %s1546_s20, 4  ;;  %s1099_s21 = int_to_ptr.vmem [resolvable:$true] %s1098_s21 }
  0x54   :  { %v1393_v32 = vld [vmem:[#allocation5 + $0x2a4] ss:$8 sps:$4 sm:$0xff]   ;;  %v1397_v35 = vld [vmem:[#allocation5 + $0x2b0] ss:$8 sps:$4 sm:$0xff]   ;;  %s1510_s22 = scalar_lea.vmem %s1099_s21, 64  ;;  %p1515_p11 = scmp.lt.s32.totalorder %s1099_s21, %s1099_s21 }
  0x55   :  { %755 = vmatpush1.bf16.msra.mxu0 %v1295_v21  ;;  %712 = vmatpush1.bf16.msra.mxu1 %v1354_v39  ;;  %v1361_v21 = vld [vmem:[#allocation5 + $0x250] ss:$8 sps:$4 sm:$0xff]   ;;  %v1405_v36 = vld [vmem:[#allocation5 + $0x2c4] ss:$8 sps:$4 sm:$0xff]   ;;  %p1511_p10 = scmp.ne.s32.totalorder %s1099_s21, %s1510_s22  ;;  %p1516_p12 = scmp.lt.s32.totalorder %s1510_s22, %s1510_s22 }
  0x56   :  { %756 = vmatprep.subr.bf16.mxu0 %v1296_v25  ;;  %713 = vmatprep.subr.bf16.mxu1 %v1358_v40  ;;  %v1375_v25 = vld [vmem:[#allocation5 + $0x274] ss:$8 sps:$4 sm:$0xff]   ;;  %v1409_v39 = vld [vmem:[#allocation5 + $0x2d0] ss:$8 sps:$4 sm:$0xff]   ;;  %v1416_v40 = vld [vmem:[#allocation5 + $0x2e4] ss:$8 sps:$4 sm:$0xff]  }
  0x57   :  { %p1517_p13 = por %p1516_p12, %p1515_p11 }
  0x59   :  { %757 = vmatpush1.bf16.msra.mxu0 %v1298_v26  ;;  %714 = vmatpush1.bf16.msra.mxu1 %v1360_v43  ;;  %v1425_v26 = vld [vmem:[#allocation2 + $0x18] ss:$0 sps:$4 sm:$0xff]   ;;  %v1420_v43 = vld [vmem:[#allocation5 + $0x2f0] ss:$8 sps:$4 sm:$0xff]   ;;  %p1518_p0 = pnand %p1517_p13, %p1511_p10 }
  0x5a   :  { %758 = vmatprep.subr.bf16.mxu0 %v1299_v29  ;;  %715 = vmatprep.subr.bf16.mxu1 %v1364_v44  ;;  %v1379_v29 = vld [vmem:[#allocation5 + $0x280] ss:$8 sps:$4 sm:$0xff]   ;;  %v1112_v44 = vcombine.low %v1629_v4, %v1629_v4 }
  0x5d   :  { %759 = vmatpush1.bf16.msra.mxu0 %v1301_v30  ;;  %716 = vmatpush1.bf16.msra.mxu1 %v1366_v47  ;;  %v1387_v30 = vld [vmem:[#allocation5 + $0x294] ss:$8 sps:$4 sm:$0xff]  }
  0x5e   :  { %760 = vmatprep.subr.bf16.mxu0 %v1302_v33  ;;  %717 = vmatprep.subr.bf16.mxu1 %v1370_v48  ;;  %v1391_v33 = vld [vmem:[#allocation5 + $0x2a0] ss:$8 sps:$4 sm:$0xff]  }
  0x61   :  { %761 = vmatpush1.bf16.msra.mxu0 %v1304_v34  ;;  %718 = vmatpush1.bf16.msra.mxu1 %v1372_v51  ;;  %v1399_v34 = vld [vmem:[#allocation5 + $0x2b4] ss:$8 sps:$4 sm:$0xff]  }
  0x62   :  { %762 = vmatprep.subr.bf16.mxu0 %v1305_v37  ;;  %719 = vmatprep.subr.bf16.mxu1 %v1376_v52  ;;  %v1403_v37 = vld [vmem:[#allocation5 + $0x2c0] ss:$8 sps:$4 sm:$0xff]  }
  0x65   :  { %763 = vmatpush1.bf16.msra.mxu0 %v1307_v38  ;;  %720 = vmatpush1.bf16.msra.mxu1 %v1378_v55  ;;  %v1411_v38 = vld [vmem:[#allocation5 + $0x2d4] ss:$8 sps:$4 sm:$0xff]  }
  0x66   :  { %764 = vmatprep.subr.bf16.mxu0 %v1308_v41  ;;  %721 = vmatprep.subr.bf16.mxu1 %v1382_v56  ;;  %v1414_v41 = vld [vmem:[#allocation5 + $0x2e0] ss:$8 sps:$4 sm:$0xff]   ;;  %v169_v56 = vld [vmem:[%s1671_s2] sm:$0x3] }
  0x69   :  { %765 = vmatpush1.bf16.msra.mxu0 %v1310_v42  ;;  %722 = vmatpush1.bf16.msra.mxu1 %v1384_v61  ;;  %v1422_v42 = vld [vmem:[#allocation5 + $0x2f4] ss:$8 sps:$4 sm:$0xff]  }
  0x6a   :  { %766 = vmatprep.subr.bf16.mxu0 %v1311_v45  ;;  %723 = vmatprep.subr.bf16.mxu1 %v1388_v63 }
  0x6d   :  { %767 = vmatpush1.bf16.msra.mxu0 %v1313_v46  ;;  %724 = vmatpush1.bf16.msra.mxu1 %v1390_v3 }
  0x6e   :  { %768 = vmatprep.subr.bf16.mxu0 %v1317_v49  ;;  %725 = vmatprep.subr.bf16.mxu1 %v1394_v5 }
  0x71   :  { %769 = vmatpush1.bf16.msra.mxu0 %v1319_v50  ;;  %726 = vmatpush1.bf16.msra.mxu1 %v1396_v7 }
  0x72   :  { %770 = vmatprep.subr.bf16.mxu0 %v1323_v53  ;;  %727 = vmatprep.subr.bf16.mxu1 %v1400_v9  ;;  %v171_v53 = vlaneseq }
  0x75   :  { %771 = vmatpush1.bf16.msra.mxu0 %v1325_v54  ;;  %728 = vmatpush1.bf16.msra.mxu1 %v1402_v11  ;;  %v172_v54 = vshrl.u32 %v171_v53, 7 }
  0x76   :  { %781 = vmatprep.subr.bf16.mxu0 %v1333_v57  ;;  %729 = vmatprep.subr.bf16.mxu1 %v1406_v13  ;;  %v1427_v13 = vld [vmem:[#allocation7] sm:$0xff]  }
  0x77   :  { %v1635_v55 = vsub.s32 0, %v172_v54  ;;  %v1640_v57 = vsub.s32 1, %v172_v54  ;;  %v1214_v54 = vld [vmem:[%s1675_s6] ss:$0 sm:$0xff] }
  0x78   :  { %773 = vmatmul.mubr.bf16.vlgmr.msra.gmra.mrb[0].mxu0 %v1110_v60 }
  0x79   :  { %782 = vmatpush1.bf16.msra.mxu0 %v1331_v58  ;;  %813 = vmatprep.mubr.bf16.mxu0 %v1113_v6  ;;  %v174_v58 = vrot.slane %v169_v56, %v1635_v55  ;;  %v178_v59 = vrot.slane %v169_v56, %v1640_v57 }
  0x7a   :  { %783 = vmatprep.subr.bf16.mxu0 %v1339_v0  ;;  %730 = vmatpush1.bf16.msra.mxu1 %v1408_v15  ;;  %v1429_v15 = vld [vmem:[#allocation7 + $0x8] sm:$0xff]  }
  0x7b   :  { %822 = vmatprep.subr.bf16.mxu1 %v1419_v17  ;;  %v1431_v17 = vld [vmem:[#allocation7 + $0x10] sm:$0xff]  }
  0x7d   :  { %784 = vmatpush1.bf16.msra.mxu0 %v1337_v1  ;;  %732 = vmatmul.mubr.bf16.vlgmr.msra.gmra.mrb[0].mxu1 %v1108_v19  ;;  %v1433_v19 = vld [vmem:[#allocation7 + $0x18] sm:$0xff]  }
  0x7e   :  { %785 = vmatprep.subr.bf16.mxu0 %v1345_v2  ;;  %823 = vmatpush1.bf16.msra.mxu1 %v1417_v20  ;;  %v1434_v20 = vld [vmem:[#allocation7 + $0x60] sm:$0xff]  }
  0x7f   :  { %854 = vmatprep.mubr.bf16.mxu1 %v1545_v23  ;;  %v1437_v23 = vld [vmem:[#allocation7 + $0x28] sm:$0xff]  }
  0x81   :  { %786 = vmatpush1.bf16.msra.mxu0 %v1343_v8 }
  0x82   :  { %787 = vmatprep.subr.bf16.mxu0 %v1351_v10 }
  0x85   :  { %788 = vmatpush1.bf16.msra.mxu0 %v1349_v12  ;;  %1213 = vmatmul.mubr.msk.bf16.vlgmr.msra.gmra.mrb[4].mxu1 %vm695_vm0, %v1425_v26  ;;  %v1426_v12 = vld [vmem:[#allocation7 + $0x40] sm:$0xff]   ;;  %v1440_v26 = vld [vmem:[#allocation7 + $0x78] sm:$0xff]  }
  0x86   :  { %789 = vmatprep.subr.bf16.mxu0 %v1357_v14  ;;  %1231 = vmatprep.subr.bf16.mxu1 %v1426_v12  ;;  %v1428_v14 = vld [vmem:[#allocation7 + $0x48] sm:$0xff]  }
  0x87   :  { %1232 = vmatpush3.bf16.msra.mxu1 %v1427_v13 }
  0x88   :  { %1233 = vmatprep.subr.bf16.mxu1 %v1428_v14 }
  0x89   :  { %790 = vmatpush1.bf16.msra.mxu0 %v1355_v16  ;;  %v1430_v16 = vld [vmem:[#allocation7 + $0x50] sm:$0xff]  }
  0x8a   :  { %791 = vmatprep.subr.bf16.mxu0 %v1363_v18  ;;  %v1432_v18 = vld [vmem:[#allocation7 + $0x58] sm:$0xff]  }
  0x8b   :  { %1234 = vmatpush3.bf16.msra.mxu1 %v1429_v15 }
  0x8c   :  { %1235 = vmatprep.subr.bf16.mxu1 %v1430_v16 }
  0x8d   :  { %792 = vmatpush1.bf16.msra.mxu0 %v1361_v21  ;;  %v1435_v21 = vld [vmem:[#allocation7 + $0x20] sm:$0xff]  }
  0x8e   :  { %793 = vmatprep.subr.bf16.mxu0 %v1369_v22  ;;  %v1436_v22 = vld [vmem:[#allocation7 + $0x68] sm:$0xff]  }
  0x8f   :  { %1236 = vmatpush3.bf16.msra.mxu1 %v1431_v17 }
  0x90   :  { %1237 = vmatprep.subr.bf16.mxu1 %v1432_v18 }
  0x91   :  { %794 = vmatpush1.bf16.msra.mxu0 %v1367_v24  ;;  %v1438_v24 = vld [vmem:[#allocation7 + $0x70] sm:$0xff]  }
  0x92   :  { %795 = vmatprep.subr.bf16.mxu0 %v1375_v25  ;;  %v1439_v25 = vld [vmem:[#allocation7 + $0x30] sm:$0xff]  }
  0x93   :  { %1238 = vmatpush3.bf16.msra.mxu1 %v1433_v19 }
  0x94   :  { %1239 = vmatprep.subr.bf16.mxu1 %v1434_v20 }
  0x95   :  { %796 = vmatpush1.bf16.msra.mxu0 %v1373_v27  ;;  %v1441_v27 = vld [vmem:[#allocation7 + $0x38] sm:$0xff]  }
  0x96   :  { %797 = vmatprep.subr.bf16.mxu0 %v1381_v28 }
  0x97   :  { %1240 = vmatpush3.bf16.msra.mxu1 %v1435_v21 }
  0x98   :  { %1241 = vmatprep.subr.bf16.mxu1 %v1436_v22 }
  0x99   :  { %798 = vmatpush1.bf16.msra.mxu0 %v1379_v29 }
  0x9a   :  { %799 = vmatprep.subr.bf16.mxu0 %v1387_v30 }
  0x9b   :  { %1242 = vmatpush3.bf16.msra.mxu1 %v1437_v23 }
  0x9c   :  { %1243 = vmatprep.subr.bf16.mxu1 %v1438_v24 }
  0x9d   :  { %800 = vmatpush1.bf16.msra.mxu0 %v1385_v31 }
  0x9e   :  { %801 = vmatprep.subr.bf16.mxu0 %v1393_v32 }
  0x9f   :  { %1244 = vmatpush3.bf16.msra.mxu1 %v1439_v25 }
  0xa0   :  { %1245 = vmatprep.subr.bf16.mxu1 %v1440_v26 }
  0xa1   :  { %802 = vmatpush1.bf16.msra.mxu0 %v1391_v33 }
  0xa2   :  { %803 = vmatprep.subr.bf16.mxu0 %v1399_v34 }
  0xa3   :  { %1246 = vmatpush3.bf16.msra.mxu1 %v1441_v27 }
  0xa5   :  { %804 = vmatpush1.bf16.msra.mxu0 %v1397_v35 }
  0xa6   :  { %805 = vmatprep.subr.bf16.mxu0 %v1405_v36  ;;  %v884_v36 = vld [vmem:[%s1672_s3] sm:$0x3] }
  0xa9   :  { %806 = vmatpush1.bf16.msra.mxu0 %v1403_v37  ;;  %v898_v37 = vld [vmem:[%s1673_s4] sm:$0x3] }
  0xaa   :  { %807 = vmatprep.subr.bf16.mxu0 %v1411_v38 }
  0xad   :  { %808 = vmatpush1.bf16.msra.mxu0 %v1409_v39 }
  0xae   :  { %809 = vmatprep.subr.bf16.mxu0 %v1416_v40  ;;  %v889_v40 = vrot.slane %v884_v36, %v1635_v55 }
  0xb1   :  { %810 = vmatpush1.bf16.msra.mxu0 %v1414_v41  ;;  %v893_v41 = vrot.slane %v884_v36, %v1640_v57 }
  0xb2   :  { %811 = vmatprep.subr.bf16.mxu0 %v1422_v42 }
  0xb5   :  { %812 = vmatpush1.bf16.msra.mxu0 %v1420_v43 }
  0xb8   :  { %814 = vmatmul.mubr.bf16.vlgmr.msra.gmra.mrb[0].mxu0 %v1112_v44  ;;  %v903_v44 = vrot.slane %v898_v37, %v1635_v55 }
 0x150   :  { %v733_v45 = vpop.f32.mrb[0].mxu1 }
 0x151   :  { %v735_v46 = vpop.f32.mrb[1].mxu1  ;;  %v734_v60 = vadd.f32 %v733_v45, %v174_v58  ;;  %v907_v45 = vrot.slane %v898_v37, %v1640_v57 }
 0x152   :  { %v737_v47 = vpop.f32.mrb[2].mxu1  ;;  %v736_v61 = vadd.f32 %v735_v46, %v178_v59 }
 0x153   :  { %v738_v48 = vpop.f32.mrb[3].mxu1 }
 0x158   :  { %v856_v49 = vpop.f32.mrb[4].mxu1 }
 0x159   :  { %v858_v50 = vpop.f32.mrb[5].mxu1 }
 0x15a   :  { %v860_v51 = vpop.f32.mrb[6].mxu1 }
 0x15b   :  { %v861_v52 = vpop.f32.mrb[7].mxu1 }
 0x18b   :  { %v815_v62 = vpop.f32.mrb[0].mxu0 }
 0x18c   :  { %v1254_v63 = vadd.f32 %v815_v62, %v734_v60  ;;  %v817_v0 = vpop.f32.mrb[1].mxu0 }
 0x18d   :  { %v1257_v1 = vadd.f32 %v817_v0, %v736_v61  ;;  %v819_v2 = vpop.f32.mrb[2].mxu0 }
 0x18e   :  { %v1255_v3 = vadd.f32 %v1254_v63, %v856_v49  ;;  %v820_v4 = vpop.f32.mrb[3].mxu0 }
 0x18f   :  { %v1258_v5 = vadd.f32 %v1257_v1, %v858_v50 }
 0x190   :  { %v863_v6 = vmax.f32 %v1255_v3, 0.0 }
 0x191   :  { %v864_v7 = vmax.f32 %v1258_v5, 0.0 }
 0x192   :  { %v868_v9 = vmul.f32 %v863_v6, %v863_v6 }
 0x193   :  { %v865_v8 = vadd.f32 %v864_v7, %v863_v6  ;;  %v869_v10 = vmul.f32 %v864_v7, %v864_v7 }
 0x195   :  { %866 = vadd.xlane.f32.xlu0 %v865_v8  ;;  %v870_v11 = vadd.f32 %v869_v10, %v868_v9 }
 0x199   :  { %871 = vadd.xlane.f32.xlu0 %v870_v11 }
 0x222   :  { %v867_v28 = vpop.xlane.xlu0 %866 }
 0x223   :  { %v873_v29 = vmul.f32 0.005, %v867_v28 }
 0x225   :  { %v875_v31 = vmul.f32 %v873_v29, %v873_v29  ;;  %v880_v38 = vsub.f32 %v863_v6, %v873_v29  ;;  %v881_v39 = vsub.f32 %v864_v7, %v873_v29 }
 0x226   :  { %v872_v30 = vpop.xlane.xlu0 %871 }
 0x227   :  { %v874_v32 = vmul.f32 0.005, %v872_v30 }
 0x229   :  { %v876_v33 = vsub.f32 %v874_v32, %v875_v31 }
 0x22b   :  { %v877_v34 = vmax.f32 %v876_v33, 0.0 }
 0x22d   :  { %v878_v35 = vadd.f32 1e-05, %v877_v34 }
 0x22f   :  { %1442 = vrsqrt.f32 %v878_v35 }
 0x239   :  { %v1443_v42 = vpop.eup %1442 }
 0x23a   :  { %v883_v43 = vmul.f32 %v1443_v42, %v881_v39  ;;  %v882_v46 = vmul.f32 %v1443_v42, %v880_v38 }
 0x23c   :  { %v897_v47 = vmul.f32 %v893_v41, %v883_v43  ;;  %v896_v48 = vmul.f32 %v889_v40, %v882_v46 }
 0x23e   :  { %v911_v49 = vadd.f32 %v907_v45, %v897_v47  ;;  %v910_v50 = vadd.f32 %v903_v44, %v896_v48 }
 0x240   :  { %v913_v51 = vpack.c.bf16 %v911_v49, %v911_v49  ;;  %v912_v52 = vpack.c.bf16 %v910_v50, %v910_v50 }
 0x242   :  { %1081 = vmatprep.mubr.bf16.mxu1 %v913_v51 }
 0x243   :  { %1082 = vmatmul.mubr.bf16.vlgmr.msra.gmra.mrb[8].mxu1 %v912_v52 }
 0x316   :  { %v1247_v53 = vpop.f32.mrb[8].mxu1 }
 0x317   :  { %v1248_v56 = vpop.f32.mrb[9].mxu1 }
 0x318   :  { %v1249_v58 = vadd.f32 %v1248_v56, %v1247_v53  ;;  %v1250_v59 = vpop.f32.mrb[10].mxu1 }
 0x319   :  { %v1251_v55 = vpop.f32.mrb[11].mxu1 }
 0x31a   :  { %v1084_v60 = vadd.f32 %v1249_v58, %v1214_v54 }
 0x31c   :  { %v1089_v57 = vmax.f32 %v1084_v60, 0.0 }
 0x31e   :  { %v1090_v61 = vpack.c.bf16 %v1089_v57, %v1089_v57 }
 0x320   :  { %1091 = vst [vmem:[#allocation8] sm:$0xf] %v1090_v61 }
 0x321   :  { %1521 = shalt.err (!%p1518_p0)
}
 0x322   :  { %s1522_s24 = scalar_lea.hbm %s1676_s7, 64 }
 0x323   :  { %p1523_p1 = scmp.ne.s32.totalorder %s1676_s7, %s1522_s24  ;;  %p1526_p2 = scmp.lt.u32.totalorder %s1522_s24, %s1676_s7 }
 0x325   :  { %p1528_p3 = pnand %p1526_p2, %p1523_p1 }
 0x327   :  { %1531 = shalt.err (!%p1528_p3)
}
 0x328   :  { %1101 = dma.vmem_to_hbm [thread:$0]  %s1099_s21, 64, %s1676_s7, [#allocation4]  }
 0x329   :  { %1536 = dma.done.wait [#allocation4], 64  }
 0x32a   :  { %1537 = vsyncadd [#allocation4], 4294967232 }
 0x32b   :  { %1105 = vsyncpa [#allocation3], 1 }
 0x32c   :  { %1106 = vsyncpa [#allocation6], 1 }
 0x32d   :  { %1107 = vsyncpa [#allocation4], 1 }

</bundles_post_ra>
